<compile_context>
chip_gen: v7x
topology: tpu7x:2x2x1
jax: 0.10.0
libtpu: 0.0.40
codegen_flags: <defaults>
</compile_context>

<pallas_src>
import math
from functools import partial

import jax
import jax.numpy as jnp
from jax.experimental import pallas as pl
from jax.experimental.pallas import tpu as pltpu

_LANE = 128
_SUBLANE = 8


def _round_up(v, m):
    return (v + m - 1) // m * m


def _leaky_relu(x, negative_slope=0.01):
    # PyTorch nn.LeakyReLU default negative_slope=0.01
    return jnp.where(x >= 0, x, negative_slope * x)


def _mlp_kernel(num_hidden_layers, x_ref, *refs):
    """Fused MLP forward on one batch tile.

    refs layout:
      w0, b0                         : Linear(n, hidden) + LeakyReLU
      w1, b1, ..., w_{L-1}, b_{L-1}  : Linear(hidden, hidden) + LeakyReLU
      w_out, b_out                   : Linear(hidden, 2*latent_dim)  (no act)
      out_ref                        : (TB, out_pad) f32 output tile
    Weights are bf16 (lane-padded), biases f32, dots accumulate in f32.
    """
    out_ref = refs[-1]
    p = refs[:-1]

    # Input layer + activation.
    h = x_ref[...]                      # bf16 activations
    w = p[0][...]                       # bf16 weights
    b = p[1][...]                       # f32 bias
    h = _leaky_relu(jnp.dot(h, w, preferred_element_type=jnp.float32) + b)

    # Hidden layers (num_layers - 1 of them), each Linear + LeakyReLU.
    for l in range(num_hidden_layers):
        w = p[2 + 2 * l][...]
        b = p[3 + 2 * l][...]
        h = _leaky_relu(
            jnp.dot(h.astype(w.dtype), w, preferred_element_type=jnp.float32) + b
        )

    # Final projection to 2 * latent_dim (no activation).
    w = p[-2][...]
    b = p[-1][...]
    z = jnp.dot(h.astype(w.dtype), w, preferred_element_type=jnp.float32) + b
    out_ref[...] = z.astype(out_ref.dtype)


def init_params(key, n, latent_dim, hidden_dim, num_layers=1, dtype=jnp.float32):
    """Deterministic init mimicking PyTorch nn.Linear (U(-1/sqrt(fan_in), +))."""
    dims = [(n, hidden_dim)]
    for _ in range(1, num_layers):
        dims.append((hidden_dim, hidden_dim))
    dims.append((hidden_dim, 2 * latent_dim))

    params = []
    for (fan_in, fan_out) in dims:
        key, kw, kb = jax.random.split(key, 3)
        bound = 1.0 / math.sqrt(fan_in)
        w = jax.random.uniform(kw, (fan_in, fan_out), dtype, -bound, bound)
        b = jax.random.uniform(kb, (1, fan_out), dtype, -bound, bound)
        params.append((w, b))
    return params


def prepare_params(params):
    """ONE-TIME lane-padding (multiples of 128) + bf16 cast of the weights.

    Call once and reuse the returned tuple for every forward: the forward path
    no longer re-pads / re-copies the weights in HBM on each call.
    Zero padding is exact (LeakyReLU(0) == 0, padded lanes never leak).
    """
    flat = []
    for (w, b) in params:
        fi, fo = w.shape
        fi_p, fo_p = _round_up(fi, _LANE), _round_up(fo, _LANE)
        flat.append(jnp.pad(w, ((0, fi_p - fi), (0, fo_p - fo))).astype(jnp.bfloat16))
        flat.append(jnp.pad(b, ((0, 0), (0, fo_p - fo))).astype(jnp.float32))
    return tuple(flat)


def _choose_batch_tile(B):
    """8-aligned batch tile: >=2 grid steps when B allows (v7x megacore),
    <=512 rows per tile, near-even split to minimize padded-row waste."""
    b8 = _round_up(B, _SUBLANE)
    if b8 <= _SUBLANE:
        return _SUBLANE
    num_tiles = max(2, -(-b8 // 512))
    return _round_up(-(-b8 // num_tiles), _SUBLANE)


def inference_network_forward(x, flat_params, latent_dim):
    """Runs the fused MLP Pallas kernel; returns (z_mu, z_logstd)."""
    B, n = x.shape
    out_dim = 2 * latent_dim
    n_pad = flat_params[0].shape[0]
    out_pad = flat_params[-2].shape[1]
    num_hidden_layers = len(flat_params) // 2 - 2
    assert n <= n_pad and out_dim <= out_pad

    TB = _choose_batch_tile(B)
    B_pad = _round_up(B, TB)
    grid = (B_pad // TB,)

    # Pad batch rows / input lanes with zeros; activations go to the MXU in bf16.
    x_p = jnp.pad(x, ((0, B_pad - B), (0, n_pad - n))).astype(jnp.bfloat16)

    # --- VMEM budget from actual shapes (x/out double-buffered, weights resident).
    io_bytes = 2 * TB * (n_pad * 2 + out_pad * 4)
    w_bytes = 0
    max_feat = out_pad
    for fp in flat_params:
        if fp.shape[0] > 1:  # weight (fi_pad >= 128)
            w_bytes += fp.shape[0] * fp.shape[1] * fp.dtype.itemsize
            max_feat = max(max_feat, fp.shape[1])
        else:                # bias, padded to 8 sublanes in VMEM
            w_bytes += _SUBLANE * fp.shape[1] * fp.dtype.itemsize
    act_bytes = 3 * TB * max_feat * 4           # live f32 activations / spill headroom
    needed = int(1.25 * (io_bytes + w_bytes + act_bytes)) + (4 << 20)
    try:
        phys_vmem = int(pltpu.get_tpu_info().vmem_capacity_bytes)
    except Exception:
        phys_vmem = 64 << 20                    # v7x per-core floor
    cap = int(phys_vmem * 0.85)
    # TODO(synk): add a hidden-dim (K/N)-tiled grid path when resident weights
    # exceed the per-core VMEM budget instead of relying on this clamp.
    vmem_limit = min(max(needed, 16 << 20), cap)

    # --- Advisory cost estimate for the XLA scheduler.
    flops = 0
    for i in range(0, len(flat_params), 2):
        fi_p, fo_p = flat_params[i].shape
        flops += 2 * B_pad * fi_p * fo_p
    bytes_accessed = int(x_p.size) * 2 + B_pad * out_pad * 4
    bytes_accessed += sum(int(fp.size) * fp.dtype.itemsize for fp in flat_params)
    cost = pl.CostEstimate(flops=int(flops), transcendentals=0,
                           bytes_accessed=int(bytes_accessed))

    def run(weight_pipeline_mode):
        in_specs = [pl.BlockSpec((TB, n_pad), lambda i: (i, 0))]
        for fp in flat_params:
            # Whole array, constant block index -> resident in VMEM across steps.
            if weight_pipeline_mode is None:
                spec = pl.BlockSpec(fp.shape, lambda i: (0, 0))
            else:
                spec = pl.BlockSpec(fp.shape, lambda i: (0, 0),
                                    pipeline_mode=weight_pipeline_mode)
            in_specs.append(spec)
        return pl.pallas_call(
            partial(_mlp_kernel, num_hidden_layers),
            out_shape=jax.ShapeDtypeStruct((B_pad, out_pad), jnp.float32),
            grid=grid,
            in_specs=in_specs,
            out_specs=pl.BlockSpec((TB, out_pad), lambda i: (i, 0)),
            compiler_params=pltpu.CompilerParams(
                dimension_semantics=("parallel",),
                vmem_limit_bytes=vmem_limit,
            ),
            cost_estimate=cost,
        )(x_p, *flat_params)

    try:
        # Single-buffer the constant-index weight/bias blocks (halves their
        # resident VMEM footprint; matters most on v7x's 64 MiB per-core VMEM).
        z = run(pl.Buffered(1))
    except Exception:
        # Fallback if this Pallas build rejects buffer_count=1.
        z = run(None)

    z = z[:B, :out_dim]
    z_mu = z[:, :latent_dim]
    z_logstd = z[:, latent_dim:]
    return z_mu, z_logstd


if __name__ == "__main__":
    # Small shapes consistent with the module's forward: x is (batch, n).
    B = 16
    n = 16
    latent_dim = 8
    hidden_dim = 32
    num_layers = 2  # input layer + 1 hidden layer + output layer

    key = jax.random.PRNGKey(0)
    kx, kp = jax.random.split(key)
    x = jax.random.normal(kx, (B, n), dtype=jnp.float32)

    params = init_params(kp, n, latent_dim, hidden_dim, num_layers=num_layers)
    flat_params = prepare_params(params)   # padded + bf16 weights, done ONCE

    z_mu, z_logstd = inference_network_forward(x, flat_params, latent_dim)
    jax.block_until_ready((z_mu, z_logstd))

    # Reference 1: same numerics as the kernel (bf16 operands, f32 accumulate).
    h = x.astype(jnp.bfloat16)
    for i, (w, b) in enumerate(params):
        h = jnp.dot(h, w.astype(jnp.bfloat16),
                    preferred_element_type=jnp.float32) + b.astype(jnp.float32)
        if i < len(params) - 1:
            h = jnp.where(h >= 0, h, 0.01 * h).astype(jnp.bfloat16)
    ref_mu_bf, ref_ls_bf = h[:, :latent_dim], h[:, latent_dim:]
    assert jnp.allclose(z_mu, ref_mu_bf, atol=1e-3, rtol=1e-3)
    assert jnp.allclose(z_logstd, ref_ls_bf, atol=1e-3, rtol=1e-3)

    # Reference 2: full-f32 PyTorch-equivalent forward (loose tol for bf16 inputs).
    h = x
    for i, (w, b) in enumerate(params):
        h = h @ w + b
        if i < len(params) - 1:
            h = jnp.where(h >= 0, h, 0.01 * h)
    ref_mu, ref_ls = h[:, :latent_dim], h[:, latent_dim:]
    assert jnp.allclose(z_mu, ref_mu, atol=2e-2, rtol=2e-2)
    assert jnp.allclose(z_logstd, ref_ls, atol=2e-2, rtol=2e-2)
    assert z_mu.shape == (B, latent_dim) and z_logstd.shape == (B, latent_dim)

    print("KERNEL_OK")
</pallas_src>

<mosaic_0001>
module attributes {stable_mosaic.version = 11 : i64} {
  func.func @_mlp_kernel(%arg0: i32, %arg1: memref<8x128xbf16, #tpu.memory_space<vmem>>, %arg2: memref<128x128xbf16, #tpu.memory_space<vmem>>, %arg3: memref<1x128xf32, #tpu.memory_space<vmem>>, %arg4: memref<128x128xbf16, #tpu.memory_space<vmem>>, %arg5: memref<1x128xf32, #tpu.memory_space<vmem>>, %arg6: memref<128x128xbf16, #tpu.memory_space<vmem>>, %arg7: memref<1x128xf32, #tpu.memory_space<vmem>>, %arg8: memref<8x128xf32, #tpu.memory_space<vmem>>) attributes {dimension_semantics = [#tpu.dimension_semantics<parallel>], iteration_bounds = array<i64: 2>, scalar_prefetch = 0 : i64, scratch_operands = 0 : i64, tpu.core_type = #tpu.core_type<tc>, window_params = [{transform_indices = @transform_0, window_bounds = array<i64: 8, 128>}, {pipeline_mode = #tpu.pipeline_mode<synchronous>, transform_indices = @transform_1, window_bounds = array<i64: 128, 128>}, {pipeline_mode = #tpu.pipeline_mode<synchronous>, transform_indices = @transform_2, window_bounds = array<i64: 1, 128>}, {pipeline_mode = #tpu.pipeline_mode<synchronous>, transform_indices = @transform_3, window_bounds = array<i64: 128, 128>}, {pipeline_mode = #tpu.pipeline_mode<synchronous>, transform_indices = @transform_4, window_bounds = array<i64: 1, 128>}, {pipeline_mode = #tpu.pipeline_mode<synchronous>, transform_indices = @transform_5, window_bounds = array<i64: 128, 128>}, {pipeline_mode = #tpu.pipeline_mode<synchronous>, transform_indices = @transform_6, window_bounds = array<i64: 1, 128>}, {transform_indices = @transform_7, window_bounds = array<i64: 8, 128>}]} {
    %c0 = arith.constant 0 : index
    %c0_0 = arith.constant 0 : index
    %0 = vector.load %arg1[%c0, %c0_0] : memref<8x128xbf16, #tpu.memory_space<vmem>>, vector<8x128xbf16>
    %c0_1 = arith.constant 0 : index
    %c0_2 = arith.constant 0 : index
    %1 = vector.load %arg2[%c0_1, %c0_2] : memref<128x128xbf16, #tpu.memory_space<vmem>>, vector<128x128xbf16>
    %c0_3 = arith.constant 0 : index
    %c0_4 = arith.constant 0 : index
    %2 = vector.load %arg3[%c0_3, %c0_4] : memref<1x128xf32, #tpu.memory_space<vmem>>, vector<1x128xf32>
    %cst = arith.constant dense<0.000000e+00> : vector<8x128xf32>
    %3 = tpu.matmul %0, %1, %cst {dimension_numbers = #tpu.dot_dimension_numbers<[1], [0], [0], [1], [0, 0, 1, 1], [], []>} : vector<8x128xbf16>, vector<128x128xbf16>, vector<8x128xf32> -> vector<8x128xf32>
    %4 = vector.broadcast %2 : vector<1x128xf32> to vector<8x128xf32>
    %5 = arith.addf %3, %4 : vector<8x128xf32>
    %cst_5 = arith.constant 0.000000e+00 : f32
    %6 = vector.broadcast %cst_5 : f32 to vector<8x128xf32>
    %7 = arith.cmpf oge, %5, %6 : vector<8x128xf32>
    %cst_6 = arith.constant 0.00999999977 : f32
    %8 = vector.broadcast %cst_6 : f32 to vector<8x128xf32>
    %9 = arith.mulf %8, %5 : vector<8x128xf32>
    %10 = arith.select %7, %5, %9 : vector<8x128xi1>, vector<8x128xf32>
    %c0_7 = arith.constant 0 : index
    %c0_8 = arith.constant 0 : index
    %11 = vector.load %arg4[%c0_7, %c0_8] : memref<128x128xbf16, #tpu.memory_space<vmem>>, vector<128x128xbf16>
    %c0_9 = arith.constant 0 : index
    %c0_10 = arith.constant 0 : index
    %12 = vector.load %arg5[%c0_9, %c0_10] : memref<1x128xf32, #tpu.memory_space<vmem>>, vector<1x128xf32>
    %13 = arith.truncf %10 : vector<8x128xf32> to vector<8x128xbf16>
    %cst_11 = arith.constant dense<0.000000e+00> : vector<8x128xf32>
    %14 = tpu.matmul %13, %11, %cst_11 {dimension_numbers = #tpu.dot_dimension_numbers<[1], [0], [0], [1], [0, 0, 1, 1], [], []>} : vector<8x128xbf16>, vector<128x128xbf16>, vector<8x128xf32> -> vector<8x128xf32>
    %15 = vector.broadcast %12 : vector<1x128xf32> to vector<8x128xf32>
    %16 = arith.addf %14, %15 : vector<8x128xf32>
    %cst_12 = arith.constant 0.000000e+00 : f32
    %17 = vector.broadcast %cst_12 : f32 to vector<8x128xf32>
    %18 = arith.cmpf oge, %16, %17 : vector<8x128xf32>
    %cst_13 = arith.constant 0.00999999977 : f32
    %19 = vector.broadcast %cst_13 : f32 to vector<8x128xf32>
    %20 = arith.mulf %19, %16 : vector<8x128xf32>
    %21 = arith.select %18, %16, %20 : vector<8x128xi1>, vector<8x128xf32>
    %c0_14 = arith.constant 0 : index
    %c0_15 = arith.constant 0 : index
    %22 = vector.load %arg6[%c0_14, %c0_15] : memref<128x128xbf16, #tpu.memory_space<vmem>>, vector<128x128xbf16>
    %c0_16 = arith.constant 0 : index
    %c0_17 = arith.constant 0 : index
    %23 = vector.load %arg7[%c0_16, %c0_17] : memref<1x128xf32, #tpu.memory_space<vmem>>, vector<1x128xf32>
    %24 = arith.truncf %21 : vector<8x128xf32> to vector<8x128xbf16>
    %cst_18 = arith.constant dense<0.000000e+00> : vector<8x128xf32>
    %25 = tpu.matmul %24, %22, %cst_18 {dimension_numbers = #tpu.dot_dimension_numbers<[1], [0], [0], [1], [0, 0, 1, 1], [], []>} : vector<8x128xbf16>, vector<128x128xbf16>, vector<8x128xf32> -> vector<8x128xf32>
    %26 = vector.broadcast %23 : vector<1x128xf32> to vector<8x128xf32>
    %27 = arith.addf %25, %26 : vector<8x128xf32>
    %c0_19 = arith.constant 0 : index
    %c0_20 = arith.constant 0 : index
    %28 = vector.load %arg8[%c0_19, %c0_20] : memref<8x128xf32, #tpu.memory_space<vmem>>, vector<8x128xf32>
    tpu.vector_store %arg8[%c0_19, %c0_20], %27 {strides = array<i32>} : memref<8x128xf32, #tpu.memory_space<vmem>>, vector<8x128xf32>,
    return
  }
  func.func @transform_0(%arg0: i32) -> (i32, i32) {
    %c0_i32 = arith.constant 0 : i32
    %c0_i32_0 = arith.constant 0 : i32
    return %arg0, %c0_i32 : i32, i32
  }
  func.func @transform_1(%arg0: i32) -> (i32, i32) {
    %c0_i32 = arith.constant 0 : i32
    %c0_i32_0 = arith.constant 0 : i32
    %c0_i32_1 = arith.constant 0 : i32
    return %c0_i32, %c0_i32_0 : i32, i32
  }
  func.func @transform_2(%arg0: i32) -> (i32, i32) {
    %c0_i32 = arith.constant 0 : i32
    %c0_i32_0 = arith.constant 0 : i32
    %c0_i32_1 = arith.constant 0 : i32
    return %c0_i32, %c0_i32_0 : i32, i32
  }
  func.func @transform_3(%arg0: i32) -> (i32, i32) {
    %c0_i32 = arith.constant 0 : i32
    %c0_i32_0 = arith.constant 0 : i32
    %c0_i32_1 = arith.constant 0 : i32
    return %c0_i32, %c0_i32_0 : i32, i32
  }
  func.func @transform_4(%arg0: i32) -> (i32, i32) {
    %c0_i32 = arith.constant 0 : i32
    %c0_i32_0 = arith.constant 0 : i32
    %c0_i32_1 = arith.constant 0 : i32
    return %c0_i32, %c0_i32_0 : i32, i32
  }
  func.func @transform_5(%arg0: i32) -> (i32, i32) {
    %c0_i32 = arith.constant 0 : i32
    %c0_i32_0 = arith.constant 0 : i32
    %c0_i32_1 = arith.constant 0 : i32
    return %c0_i32, %c0_i32_0 : i32, i32
  }
  func.func @transform_6(%arg0: i32) -> (i32, i32) {
    %c0_i32 = arith.constant 0 : i32
    %c0_i32_0 = arith.constant 0 : i32
    %c0_i32_1 = arith.constant 0 : i32
    return %c0_i32, %c0_i32_0 : i32, i32
  }
  func.func @transform_7(%arg0: i32) -> (i32, i32) {
    %c0_i32 = arith.constant 0 : i32
    %c0_i32_0 = arith.constant 0 : i32
    return %arg0, %c0_i32 : i32, i32
  }
}

module attributes {stable_mosaic.version = 11 : i64} {
  func.func @_mlp_kernel(%arg0: i32, %arg1: memref<8x128xbf16, #tpu.memory_space<vmem>>, %arg2: memref<128x128xbf16, #tpu.memory_space<vmem>>, %arg3: memref<1x128xf32, #tpu.memory_space<vmem>>, %arg4: memref<128x128xbf16, #tpu.memory_space<vmem>>, %arg5: memref<1x128xf32, #tpu.memory_space<vmem>>, %arg6: memref<128x128xbf16, #tpu.memory_space<vmem>>, %arg7: memref<1x128xf32, #tpu.memory_space<vmem>>, %arg8: memref<8x128xf32, #tpu.memory_space<vmem>>) attributes {dimension_semantics = [#tpu.dimension_semantics<parallel>], iteration_bounds = array<i64: 2>, scalar_prefetch = 0 : i64, scratch_operands = 0 : i64, tpu.core_type = #tpu.core_type<tc>, window_params = [{transform_indices = @transform_0, window_bounds = array<i64: 8, 128>}, {pipeline_mode = #tpu.pipeline_mode<synchronous>, transform_indices = @transform_1, window_bounds = array<i64: 128, 128>}, {pipeline_mode = #tpu.pipeline_mode<synchronous>, transform_indices = @transform_2, window_bounds = array<i64: 1, 128>}, {pipeline_mode = #tpu.pipeline_mode<synchronous>, transform_indices = @transform_3, window_bounds = array<i64: 128, 128>}, {pipeline_mode = #tpu.pipeline_mode<synchronous>, transform_indices = @transform_4, window_bounds = array<i64: 1, 128>}, {pipeline_mode = #tpu.pipeline_mode<synchronous>, transform_indices = @transform_5, window_bounds = array<i64: 128, 128>}, {pipeline_mode = #tpu.pipeline_mode<synchronous>, transform_indices = @transform_6, window_bounds = array<i64: 1, 128>}, {transform_indices = @transform_7, window_bounds = array<i64: 8, 128>}]} {
    %c0 = arith.constant 0 : index
    %c0_0 = arith.constant 0 : index
    %0 = vector.load %arg1[%c0, %c0_0] : memref<8x128xbf16, #tpu.memory_space<vmem>>, vector<8x128xbf16>
    %c0_1 = arith.constant 0 : index
    %c0_2 = arith.constant 0 : index
    %1 = vector.load %arg2[%c0_1, %c0_2] : memref<128x128xbf16, #tpu.memory_space<vmem>>, vector<128x128xbf16>
    %c0_3 = arith.constant 0 : index
    %c0_4 = arith.constant 0 : index
    %2 = vector.load %arg3[%c0_3, %c0_4] : memref<1x128xf32, #tpu.memory_space<vmem>>, vector<1x128xf32>
    %cst = arith.constant dense<0.000000e+00> : vector<8x128xf32>
    %3 = tpu.matmul %0, %1, %cst {dimension_numbers = #tpu.dot_dimension_numbers<[1], [0], [0], [1], [0, 0, 1, 1], [], []>} : vector<8x128xbf16>, vector<128x128xbf16>, vector<8x128xf32> -> vector<8x128xf32>
    %4 = vector.broadcast %2 : vector<1x128xf32> to vector<8x128xf32>
    %5 = arith.addf %3, %4 : vector<8x128xf32>
    %cst_5 = arith.constant 0.000000e+00 : f32
    %6 = vector.broadcast %cst_5 : f32 to vector<8x128xf32>
    %7 = arith.cmpf oge, %5, %6 : vector<8x128xf32>
    %cst_6 = arith.constant 0.00999999977 : f32
    %8 = vector.broadcast %cst_6 : f32 to vector<8x128xf32>
    %9 = arith.mulf %8, %5 : vector<8x128xf32>
    %10 = arith.select %7, %5, %9 : vector<8x128xi1>, vector<8x128xf32>
    %c0_7 = arith.constant 0 : index
    %c0_8 = arith.constant 0 : index
    %11 = vector.load %arg4[%c0_7, %c0_8] : memref<128x128xbf16, #tpu.memory_space<vmem>>, vector<128x128xbf16>
    %c0_9 = arith.constant 0 : index
    %c0_10 = arith.constant 0 : index
    %12 = vector.load %arg5[%c0_9, %c0_10] : memref<1x128xf32, #tpu.memory_space<vmem>>, vector<1x128xf32>
    %13 = arith.truncf %10 : vector<8x128xf32> to vector<8x128xbf16>
    %cst_11 = arith.constant dense<0.000000e+00> : vector<8x128xf32>
    %14 = tpu.matmul %13, %11, %cst_11 {dimension_numbers = #tpu.dot_dimension_numbers<[1], [0], [0], [1], [0, 0, 1, 1], [], []>} : vector<8x128xbf16>, vector<128x128xbf16>, vector<8x128xf32> -> vector<8x128xf32>
    %15 = vector.broadcast %12 : vector<1x128xf32> to vector<8x128xf32>
    %16 = arith.addf %14, %15 : vector<8x128xf32>
    %cst_12 = arith.constant 0.000000e+00 : f32
    %17 = vector.broadcast %cst_12 : f32 to vector<8x128xf32>
    %18 = arith.cmpf oge, %16, %17 : vector<8x128xf32>
    %cst_13 = arith.constant 0.00999999977 : f32
    %19 = vector.broadcast %cst_13 : f32 to vector<8x128xf32>
    %20 = arith.mulf %19, %16 : vector<8x128xf32>
    %21 = arith.select %18, %16, %20 : vector<8x128xi1>, vector<8x128xf32>
    %c0_14 = arith.constant 0 : index
    %c0_15 = arith.constant 0 : index
    %22 = vector.load %arg6[%c0_14, %c0_15] : memref<128x128xbf16, #tpu.memory_space<vmem>>, vector<128x128xbf16>
    %c0_16 = arith.constant 0 : index
    %c0_17 = arith.constant 0 : index
    %23 = vector.load %arg7[%c0_16, %c0_17] : memref<1x128xf32, #tpu.memory_space<vmem>>, vector<1x128xf32>
    %24 = arith.truncf %21 : vector<8x128xf32> to vector<8x128xbf16>
    %cst_18 = arith.constant dense<0.000000e+00> : vector<8x128xf32>
    %25 = tpu.matmul %24, %22, %cst_18 {dimension_numbers = #tpu.dot_dimension_numbers<[1], [0], [0], [1], [0, 0, 1, 1], [], []>} : vector<8x128xbf16>, vector<128x128xbf16>, vector<8x128xf32> -> vector<8x128xf32>
    %26 = vector.broadcast %23 : vector<1x128xf32> to vector<8x128xf32>
    %27 = arith.addf %25, %26 : vector<8x128xf32>
    %c0_19 = arith.constant 0 : index
    %c0_20 = arith.constant 0 : index
    %28 = vector.load %arg8[%c0_19, %c0_20] : memref<8x128xf32, #tpu.memory_space<vmem>>, vector<8x128xf32>
    tpu.vector_store %arg8[%c0_19, %c0_20], %27 {strides = array<i32>} : memref<8x128xf32, #tpu.memory_space<vmem>>, vector<8x128xf32>,
    return
  }
  func.func @transform_0(%arg0: i32) -> (i32, i32) {
    %c0_i32 = arith.constant 0 : i32
    %c0_i32_0 = arith.constant 0 : i32
    return %arg0, %c0_i32 : i32, i32
  }
  func.func @transform_1(%arg0: i32) -> (i32, i32) {
    %c0_i32 = arith.constant 0 : i32
    %c0_i32_0 = arith.constant 0 : i32
    %c0_i32_1 = arith.constant 0 : i32
    return %c0_i32, %c0_i32_0 : i32, i32
  }
  func.func @transform_2(%arg0: i32) -> (i32, i32) {
    %c0_i32 = arith.constant 0 : i32
    %c0_i32_0 = arith.constant 0 : i32
    %c0_i32_1 = arith.constant 0 : i32
    return %c0_i32, %c0_i32_0 : i32, i32
  }
  func.func @transform_3(%arg0: i32) -> (i32, i32) {
    %c0_i32 = arith.constant 0 : i32
    %c0_i32_0 = arith.constant 0 : i32
    %c0_i32_1 = arith.constant 0 : i32
    return %c0_i32, %c0_i32_0 : i32, i32
  }
  func.func @transform_4(%arg0: i32) -> (i32, i32) {
    %c0_i32 = arith.constant 0 : i32
    %c0_i32_0 = arith.constant 0 : i32
    %c0_i32_1 = arith.constant 0 : i32
    return %c0_i32, %c0_i32_0 : i32, i32
  }
  func.func @transform_5(%arg0: i32) -> (i32, i32) {
    %c0_i32 = arith.constant 0 : i32
    %c0_i32_0 = arith.constant 0 : i32
    %c0_i32_1 = arith.constant 0 : i32
    return %c0_i32, %c0_i32_0 : i32, i32
  }
  func.func @transform_6(%arg0: i32) -> (i32, i32) {
    %c0_i32 = arith.constant 0 : i32
    %c0_i32_0 = arith.constant 0 : i32
    %c0_i32_1 = arith.constant 0 : i32
    return %c0_i32, %c0_i32_0 : i32, i32
  }
  func.func @transform_7(%arg0: i32) -> (i32, i32) {
    %c0_i32 = arith.constant 0 : i32
    %c0_i32_0 = arith.constant 0 : i32
    return %arg0, %c0_i32 : i32, i32
  }
}

</mosaic_0001>

<bundles_post_ra>
// kernel: tpu_custom_call.1
= control target key start
LH: loop header
LB: loop body
LE: loop exit
PB: predicated region body
PF: predicated region fallthrough
CT: control target
= control target key end

     0   :  { %12 = vsyncpa [#allocation3], 0  ;;  %s1577_s0 = inlined_call_operand.hbm [shape: bf16[16,128], index: 0, kind: input, shape index: {}]   ;;  %s1578_s1 = inlined_call_operand.hbm [shape: bf16[128,128], index: 1, kind: input, shape index: {}]   ;;  %s1579_s2 = inlined_call_operand.vmem [shape: f32[1,128], index: 2, kind: input, shape index: {}]   ;;  %s1580_s3 = inlined_call_operand.hbm [shape: bf16[128,128], index: 3, kind: input, shape index: {}]   ;;  %s1581_s4 = inlined_call_operand.vmem [shape: f32[1,128], index: 4, kind: input, shape index: {}]   ;;  %s1582_s5 = inlined_call_operand.hbm [shape: bf16[128,128], index: 5, kind: input, shape index: {}]   ;;  %s1583_s6 = inlined_call_operand.vmem [shape: f32[1,128], index: 6, kind: input, shape index: {}]   ;;  %s1584_s7 = inlined_call_operand.hbm [shape: f32[16,128], index: 7, kind: output, shape index: {}]  }
   0x1   :  { %14 = vsyncpa [#allocation3 + $0x1], 0 }
   0x2   :  { %15 = vsyncpa [#allocation6], 0 }
   0x3   :  { %16 = vsyncpa [#allocation9], 0 }
   0x4   :  { %17 = vsyncpa [#allocation4], 0 }
   0x5   :  { %19 = vsyncpa [#allocation4 + $0x1], 0  ;;  %s1271_s24 = smov 0   ;;  %s1273_s25 = smov 0  }
   0x6   :  { %s1275_s26 = smov 0   ;;  %s1277_s27 = smov 0  }
   0x7 LB: > { %s1292_s28 = sadd.s32 4294967295, %s1220_s27   ;;  %s795_s29 = sadd.s32 4294967294, %s1220_s27   ;;  %s1220_s27 = sphi %s1277_s27, %s1610_s27   ;;  %s1216_s26 = sphi %s1275_s26, %s1609_s26   ;;  %s1212_s25 = sphi %s1273_s25, %s1608_s25   ;;  %s1208_s24 = sphi %s1271_s24, %s1607_s24  }
   0x8   : > { %p45_p0 = scmp.ne.s32.totalorder %s1212_s25, %s1208_s24  ;;  %p1585_p1 = scmp.eq.s32.totalorder %s1292_s28, 0 }
   0x9   : > { %p201_p3 = scmp.eq.s32.totalorder %s795_s29, 1  ;;  %p796_p5 = scmp.ge.s32.totalorder %s1220_s27, 1 }
   0xa   : > { %p1301_p4 = por %p1585_p1, %p45_p0  ;;  %p208_p7 = scmp.lt.s32.totalorder %s1220_s27, 3 }
   0xb   : > { %p1306_p6 = por %p201_p3, %p45_p0  ;;  %s1222_s10 = smov [#allocation5]  }
   0xc   : > { %s1589_s30 = scalar_select %p1301_p4, 1, 0 }
   0xd   : > { %s1590_s8 = scalar_select %p1306_p6, 1, 0 }
   0xe   : > { %p1311_p8 = pnand %p796_p5, %p208_p7  ;;  %s220_s11 = sshll.u32 %s1222_s10, 4  ;;  %s1315_s11 = int_to_ptr.vmem [resolvable:$true] %s220_s11 }
   0xf   : > { %1591 = sst [smem:[#allocation15_spill]] %s1590_s8  ;;  %s1223_s13 = smov [#allocation7]  }
  0x10   : > { %s1592_s9 = scalar_select %p1311_p8, 1, 0 }
  0x11   : > { %p943_p9 = pneg %p1311_p8  ;;  %s236_s14 = sshll.u32 %s1223_s13, 4  ;;  %s1326_s14 = int_to_ptr.vmem [resolvable:$true] %s236_s14 }
  0x12   : > { %s1224_s15 = smov [#allocation8]   ;;  %s1032_s19 = scalar_lea.hbm %s1578_s1, 1024 }
  0x13   : > { %p1322_p11 = pnand %p943_p9, %p1585_p1  ;;  %s1328_s16 = sshll.u32 %s1224_s15, 4  ;;  %s253_s16 = int_to_ptr.vmem [resolvable:$true] %s1328_s16 }
  0x14   : > { %p1033_p12 = scmp.ne.s32.totalorder %s1578_s1, %s1032_s19  ;;  %p1039_p5 = scmp.lt.u32.totalorder %s1032_s19, %s1578_s1 }
  0x15   : > { %p1338_p13 = pneg %p1322_p11 }
  0x17   : > { %p1035_p0 = pnand %p1338_p13, %p1033_p12 }
  0x19   : > { %p1036_p3 = pneg %p1035_p0 }
  0x1b   : > { %p1041_p7 = pnand %p1039_p5, %p1036_p3 }
  0x1d   : > { %1044 = shalt.err (!%p1041_p7)
}
  0x1e   : > { %s1045_s10 = scalar_lea.vmem %s1315_s11, 1024  ;;  %p1053_p2 = scmp.lt.s32.totalorder %s1315_s11, %s1315_s11 }
  0x1f   : > { %p1046_p9 = scmp.ne.s32.totalorder %s1315_s11, %s1045_s10  ;;  %p1054_p6 = scmp.lt.s32.totalorder %s1045_s10, %s1045_s10 }
  0x21   : > { %p1048_p10 = pnand %p1046_p9, %p1338_p13  ;;  %p1055_p12 = por %p1054_p6, %p1053_p2 }
  0x23   : > { %p1049_p1 = pneg %p1048_p10 }
  0x25   : > { %p1056_p0 = pnand %p1055_p12, %p1049_p1 }
  0x27   : > { %1059 = shalt.err (!%p1056_p0)
}
  0x28   : > { %s1225_s13 = smov 64   ;;  %s1226_s15 = smov 4  }
  0x29   : > { %946 = dma.hbm_to_vmem [thread:$0]  (!%p1322_p11), %s1578_s1, 1024, %s1315_s11, [#allocation6], %s1225_s13, %s1225_s13, %s1226_s15  }
  0x2a   : > { %s1060_s21 = scalar_lea.hbm %s1580_s3, 1024 }
  0x2b   : > { %p1061_p1 = scmp.ne.s32.totalorder %s1580_s3, %s1060_s21  ;;  %p1067_p10 = scmp.lt.u32.totalorder %s1060_s21, %s1580_s3 }
  0x2d   : > { %p1063_p2 = pnand %p1061_p1, %p1338_p13 }
  0x2f   : > { %p1064_p6 = pneg %p1063_p2 }
  0x31   : > { %p1069_p3 = pnand %p1067_p10, %p1064_p6 }
  0x33   : > { %1072 = shalt.err (!%p1069_p3)
}
  0x34   : > { %s1073_s11 = scalar_lea.vmem %s1326_s14, 1024  ;;  %p1081_p12 = scmp.lt.s32.totalorder %s1326_s14, %s1326_s14 }
  0x35   : > { %p1074_p5 = scmp.ne.s32.totalorder %s1326_s14, %s1073_s11  ;;  %p1082_p0 = scmp.lt.s32.totalorder %s1073_s11, %s1073_s11 }
  0x37   : > { %p1076_p7 = pnand %p1074_p5, %p1338_p13  ;;  %p1083_p1 = por %p1082_p0, %p1081_p12 }
  0x39   : > { %p1077_p9 = pneg %p1076_p7 }
  0x3b   : > { %p1084_p2 = pnand %p1083_p1, %p1077_p9 }
  0x3d   : > { %1087 = shalt.err (!%p1084_p2)
}
  0x3e   : > { %949 = dma.hbm_to_vmem [thread:$0]  (!%p1322_p11), %s1580_s3, 1024, %s1326_s14, [#allocation6], %s1225_s13, %s1225_s13, %s1226_s15  }
  0x3f   : > { %s1088_s20 = scalar_lea.hbm %s1582_s5, 1024 }
  0x40   : > { %p1089_p6 = scmp.ne.s32.totalorder %s1582_s5, %s1088_s20  ;;  %p1095_p5 = scmp.lt.u32.totalorder %s1088_s20, %s1582_s5 }
  0x42   : > { %p1091_p10 = pnand %p1089_p6, %p1338_p13 }
  0x44   : > { %p1092_p3 = pneg %p1091_p10 }
  0x46   : > { %p1097_p7 = pnand %p1095_p5, %p1092_p3 }
  0x48   : > { %1100 = shalt.err (!%p1097_p7)
}
  0x49   : > { %s1101_s11 = scalar_lea.vmem %s253_s16, 1024  ;;  %p1109_p1 = scmp.lt.s32.totalorder %s253_s16, %s253_s16 }
  0x4a   : > { %p1102_p9 = scmp.ne.s32.totalorder %s253_s16, %s1101_s11  ;;  %p1110_p2 = scmp.lt.s32.totalorder %s1101_s11, %s1101_s11 }
  0x4c   : > { %p1104_p12 = pnand %p1102_p9, %p1338_p13  ;;  %p1111_p4 = por %p1110_p2, %p1109_p1 }
  0x4e   : > { %p1105_p0 = pneg %p1104_p12 }
  0x50   : > { %p1112_p8 = pnand %p1111_p4, %p1105_p0 }
  0x52   : > { %1115 = shalt.err (!%p1112_p8)
}
  0x53   : > { %952 = dma.hbm_to_vmem [thread:$0]  (!%p1322_p11), %s1582_s5, 1024, %s253_s16, [#allocation9], %s1225_s13, %s1225_s13, %s1226_s15  }
  0x54   : > { %s1411_s22 = sadd.s32 1, %s1220_s27   ;;  %s32_s17 = sadd.s32 1, %s1216_s26 }
  0x55   : > { %s29_s12 = ssub.s32 %s1220_s27, %s1411_s22  ;;  %p39_p8 = scmp.ne.s32.totalorder %s1216_s26, %s1212_s25 }
  0x56   : > { %p30_p4 = scmp.eq.s32.totalorder %s29_s12, 0  ;;  %p40_p13 = scmp.eq.s32.totalorder %s1220_s27, 0 }
  0x57   : > { %p964_p6 = scmp.lt.s32.totalorder %s1220_s27, 2  ;;  %p1595_p3 = scmp.eq.s32.totalorder %s1292_s28, 1 }
  0x58   : > { %s1421_s18 = scalar_select %p30_p4, %s1216_s26, %s32_s17  }
  0x59   : > { %p41_p10 = por %p40_p13, %p39_p8  ;;  %p1425_p5 = por %p1595_p3, %p39_p8 }
  0x5a   : > { %s269_s20 = sand.u32 1, %s1216_s26   ;;  %s802_s21 = sshll.u32 %s1220_s27, 6 }
  0x5b   : > { %s801_s16 = sshll.u32 %s269_s20, 2  ;;  %s1434_s23 = scalar_lea.hbm %s1577_s0, %s802_s21 }
  0x5c   : > { %s273_s29 = scalar_lea.vmem [#allocation2], %s801_s16  ;;  %p1436_p11 = pnand %p964_p6, %p41_p10 }
  0x5d   : > { %s280_s10 = sshll.u32 %s273_s29, 4  ;;  %s270_s14 = scalar_lea.sflag [#allocation3], %s269_s20  ;;  %s1440_s10 = int_to_ptr.vmem [resolvable:$true] %s280_s10 }
  0x5e   : > { %s1116_s8 = scalar_lea.hbm %s1434_s23, 64  ;;  %p1118_p9 = pneg %p1436_p11 }
  0x5f   : > { %p1117_p7 = scmp.ne.s32.totalorder %s1434_s23, %s1116_s8  ;;  %s1121_s21 = scalar_lea.hbm %s1577_s0, 128 }
  0x60   : > { %p1122_p1 = scmp.lt.u32.totalorder %s1434_s23, %s1577_s0  ;;  %p1123_p2 = scmp.lt.u32.totalorder %s1121_s21, %s1116_s8 }
  0x61   : > { %p1119_p12 = pnand %p1118_p9, %p1117_p7  ;;  %p1125_p8 = scmp.lt.u32.totalorder %s1116_s8, %s1434_s23 }
  0x62   : > { %p1124_p4 = por %p1123_p2, %p1122_p1 }
  0x63   : > { %p1120_p0 = pneg %p1119_p12 }
  0x64   : > { %p1126_p13 = por %p1125_p8, %p1124_p4 }
  0x66   : > { %p1127_p6 = pnand %p1126_p13, %p1120_p0 }
  0x68   : > { %1130 = shalt.err (!%p1127_p6)
}
  0x69   : > { %s1131_s20 = scalar_lea.vmem %s1440_s10, 64  ;;  %s1227_s15 = smov [#allocation2]  }
  0x6a   : > { %p1132_p10 = scmp.ne.s32.totalorder %s1440_s10, %s1131_s20  ;;  %s1136_s29 = sshll.u32 %s1227_s15, 4  ;;  %s1137_s29 = int_to_ptr.vmem [resolvable:$false] %s1136_s29 }
  0x6b   : > { %s1138_s12 = scalar_lea.vmem %s1137_s29, 128  ;;  %p1139_p12 = scmp.lt.s32.totalorder %s1440_s10, %s1137_s29 }
  0x6c   : > { %p1134_p3 = pnand %p1132_p10, %p1118_p9  ;;  %p1140_p1 = scmp.lt.s32.totalorder %s1138_s12, %s1131_s20 }
  0x6e   : > { %p1135_p7 = pneg %p1134_p3  ;;  %p1141_p2 = por %p1140_p1, %p1139_p12 }
  0x70   : > { %p1142_p4 = pnand %p1141_p2, %p1135_p7 }
  0x72   : > { %1145 = shalt.err (!%p1142_p4)
}
  0x73   : > { %956 = dma.hbm_to_vmem [thread:$0]  (!%p1436_p11), %s1434_s23, 64, %s1440_s10, %s270_s14  }
  0x74   : > { %p1598_p0 = scmp.ne.s32.totalorder %s1592_s9, 0 }
  0x75   : > { %s1470_s8 = sand.u32 (!%p1598_p0), 1, %s1212_s25   ;;  %p1599_p9 = scmp.ne.s32.totalorder (!%p1598_p0), %s1589_s30, 0 }
  0x76   : > { %289 = sbr.rel (%p1598_p0) target bundleno = 833 (0x341), region = 48  ;;  %s804_s17 = sshll.u32 (!%p1598_p0), %s1470_s8, 2 }
  0x77   : > { %s292_s21 = scalar_lea.sflag (!%p1598_p0), [#allocation3], %s1470_s8  ;;  %s1474_s16 = scalar_lea.vmem (!%p1598_p0), [#allocation2], %s804_s17 }
  0x7d   : > { %1191 = dma.done.wait (%p1599_p9), %s292_s21, 64  }
  0x7e   : > { %1193 = vsyncadd (%p1599_p9), %s292_s21, 4294967232  ;;  %p1600_p11 = scmp.eq.s32.totalorder %s1292_s28, 0 }
  0x80   : > { %1195 = dma.done.wait (%p1600_p11), [#allocation6], 2048   ;;  %p1601_p8 = pmov %p1600_p11 }
  0x82   : > { %1197 = vsyncadd (%p1601_p8), [#allocation6], 4294965248  ;;  %p1602_p13 = pmov %p1601_p8 }
  0x83   : > { %p1603_p6 = pmov %p1601_p8 }
  0x84   : > { %1199 = dma.done.wait (%p1602_p13), [#allocation9], 1024  }
  0x85   : > { %1201 = vsyncadd (%p1603_p6), [#allocation9], 4294966272  ;;  %v1228_v0 = vmov 0.0   ;;  %vm1229_vm0 = vmmov 0   ;;  %v1008_v1 = vld [vmem:[#allocation5] sm:$0xff]   ;;  %v1009_v2 = vld [vmem:[#allocation5 + $0x8] sm:$0xff]  }
  0x86   : > { %867 = vmatprep.subr.bf16.mxu0 %v1228_v0  ;;  %883 = vmatprep.mubr.msk.bf16.mxu0 %vm1229_vm0, %v1228_v0  ;;  %v1010_v3 = vld [vmem:[#allocation5 + $0x10] sm:$0xff]   ;;  %v1016_v4 = vld [vmem:[#allocation7] sm:$0xff]   ;;  %v1011_v5 = vld [vmem:[#allocation5 + $0x18] sm:$0xff]   ;;  %s808_s11 = sshll.u32 %s1470_s8, 3  ;;  %s837_s20 = sshll.u32 %s1292_s28, 7 }
  0x87   : > { %887 = vmatprep.subr.bf16.mxu1 %v1228_v0  ;;  %903 = vmatprep.mubr.msk.bf16.mxu1 %vm1229_vm0, %v1228_v0  ;;  %v1017_v6 = vld [vmem:[#allocation7 + $0x8] sm:$0xff]   ;;  %v1012_v7 = vld [vmem:[#allocation5 + $0x20] sm:$0xff]   ;;  %v1018_v8 = vld [vmem:[#allocation7 + $0x10] sm:$0xff]   ;;  %s337_s15 = scalar_lea.vmem [#allocation10], %s808_s11  ;;  %s1533_s21 = scalar_lea.hbm %s1584_s7, %s837_s20 }
  0x88   : > { %868 = vmatpush3.bf16.msra.mxu0 %v1008_v1  ;;  %888 = vmatpush3.bf16.msra.mxu1 %v1016_v4  ;;  %v1013_v9 = vld [vmem:[#allocation5 + $0x28] sm:$0xff]   ;;  %v1019_v10 = vld [vmem:[#allocation7 + $0x18] sm:$0xff]   ;;  %v1014_v11 = vld [vmem:[#allocation5 + $0x30] sm:$0xff]   ;;  %s696_s29 = sshll.u32 %s337_s15, 4  ;;  %s1230_s30 = smov [#allocation10]   ;;  %s1535_s29 = int_to_ptr.vmem [resolvable:$true] %s696_s29 }
  0x89   : > { %869 = vmatprep.subr.bf16.mxu0 %v1228_v0  ;;  %889 = vmatprep.subr.bf16.mxu1 %v1228_v0  ;;  %v1020_v12 = vld [vmem:[#allocation7 + $0x20] sm:$0xff]   ;;  %v1015_v13 = vld [vmem:[#allocation5 + $0x38] sm:$0xff]   ;;  %v1021_v14 = vld [vmem:[#allocation7 + $0x28] sm:$0xff]   ;;  %s1146_s28 = scalar_lea.vmem %s1535_s29, 128  ;;  %s1150_s9 = sshll.u32 %s1230_s30, 4  ;;  %s1151_s9 = int_to_ptr.vmem [resolvable:$false] %s1150_s9 }
  0x8a   : > { %v339_v15 = vld [vmem:[%s1474_s16] sm:$0xf]  ;;  %v1022_v16 = vld [vmem:[#allocation7 + $0x30] sm:$0xff]   ;;  %v1024_v18 = vld [vmem:[#allocation8] sm:$0xff]   ;;  %s683_s16 = scalar_lea.sflag [#allocation4], %s1470_s8  ;;  %p1147_p10 = scmp.ne.s32.totalorder %s1535_s29, %s1146_s28 }
  0x8b   : > { %v1023_v17 = vld [vmem:[#allocation7 + $0x38] sm:$0xff]   ;;  %v1025_v19 = vld [vmem:[#allocation8 + $0x8] sm:$0xff]   ;;  %v1026_v20 = vld [vmem:[#allocation8 + $0x10] sm:$0xff]   ;;  %s1152_s23 = scalar_lea.vmem %s1151_s9, 256  ;;  %p1153_p12 = scmp.lt.s32.totalorder %s1535_s29, %s1151_s9 }
  0x8c   : > { %870 = vmatpush3.bf16.msra.mxu0 %v1009_v2  ;;  %890 = vmatpush3.bf16.msra.mxu1 %v1017_v6  ;;  %v1027_v21 = vld [vmem:[#allocation8 + $0x18] sm:$0xff]   ;;  %v1028_v22 = vld [vmem:[#allocation8 + $0x20] sm:$0xff]   ;;  %v1029_v23 = vld [vmem:[#allocation8 + $0x28] sm:$0xff]   ;;  %p1148_p3 = pnand %p1147_p10, %p1425_p5  ;;  %p1154_p1 = scmp.lt.s32.totalorder %s1152_s23, %s1146_s28 }
  0x8d   : > { %871 = vmatprep.subr.bf16.mxu0 %v1228_v0  ;;  %891 = vmatprep.subr.bf16.mxu1 %v1228_v0  ;;  %v809_v24 = vld [vmem:[%s1579_s2] ss:$0 sm:$0xff]  ;;  %v1030_v33 = vld [vmem:[#allocation8 + $0x30] sm:$0xff]  }
  0x8e   : > { %v1031_v34 = vld [vmem:[#allocation8 + $0x38] sm:$0xff]   ;;  %p1149_p7 = pneg %p1148_p3  ;;  %p1155_p2 = por %p1154_p1, %p1153_p12 }
  0x8f   : > { %v818_v35 = vld [vmem:[%s1581_s4] ss:$0 sm:$0xff] }
  0x90   : > { %872 = vmatpush3.bf16.msra.mxu0 %v1010_v3  ;;  %892 = vmatpush3.bf16.msra.mxu1 %v1018_v8  ;;  %v827_v44 = vld [vmem:[%s1583_s6] ss:$0 sm:$0xff]  ;;  %p1156_p4 = pnand %p1155_p2, %p1149_p7 }
  0x91   : > { %873 = vmatprep.subr.bf16.mxu0 %v1228_v0  ;;  %893 = vmatprep.subr.bf16.mxu1 %v1228_v0 }
  0x94   : > { %874 = vmatpush3.bf16.msra.mxu0 %v1011_v5  ;;  %894 = vmatpush3.bf16.msra.mxu1 %v1019_v10 }
  0x95   : > { %875 = vmatprep.subr.bf16.mxu0 %v1228_v0  ;;  %895 = vmatprep.subr.bf16.mxu1 %v1228_v0 }
  0x98   : > { %876 = vmatpush3.bf16.msra.mxu0 %v1012_v7  ;;  %896 = vmatpush3.bf16.msra.mxu1 %v1020_v12 }
  0x99   : > { %877 = vmatprep.subr.bf16.mxu0 %v1228_v0  ;;  %897 = vmatprep.subr.bf16.mxu1 %v1228_v0 }
  0x9c   : > { %878 = vmatpush3.bf16.msra.mxu0 %v1013_v9  ;;  %898 = vmatpush3.bf16.msra.mxu1 %v1021_v14 }
  0x9d   : > { %879 = vmatprep.subr.bf16.mxu0 %v1228_v0  ;;  %899 = vmatprep.subr.bf16.mxu1 %v1228_v0 }
  0xa0   : > { %880 = vmatpush3.bf16.msra.mxu0 %v1014_v11  ;;  %900 = vmatpush3.bf16.msra.mxu1 %v1022_v16 }
  0xa1   : > { %881 = vmatprep.subr.bf16.mxu0 %v1228_v0  ;;  %901 = vmatprep.subr.bf16.mxu1 %v1228_v0 }
  0xa4   : > { %882 = vmatpush3.bf16.msra.mxu0 %v1015_v13  ;;  %902 = vmatpush3.bf16.msra.mxu1 %v1023_v17 }
  0xa5   : > { %907 = vmatprep.subr.bf16.mxu0 %v1228_v0 }
  0xa7   : > { %884 = vmatmul.mubr.bf16.vlgmr.msra.gmra.mrb[0].mxu0 %v339_v15 }
  0xa8   : > { %923 = vmatprep.mubr.msk.bf16.mxu0 %vm1229_vm0, %v1228_v0  ;;  %908 = vmatpush3.bf16.msra.mxu0 %v1024_v18 }
  0xa9   : > { %909 = vmatprep.subr.bf16.mxu0 %v1228_v0 }
  0xac   : > { %910 = vmatpush3.bf16.msra.mxu0 %v1025_v19 }
  0xad   : > { %911 = vmatprep.subr.bf16.mxu0 %v1228_v0 }
  0xb0   : > { %912 = vmatpush3.bf16.msra.mxu0 %v1026_v20 }
  0xb1   : > { %913 = vmatprep.subr.bf16.mxu0 %v1228_v0 }
  0xb4   : > { %914 = vmatpush3.bf16.msra.mxu0 %v1027_v21 }
  0xb5   : > { %915 = vmatprep.subr.bf16.mxu0 %v1228_v0 }
  0xb8   : > { %916 = vmatpush3.bf16.msra.mxu0 %v1028_v22 }
  0xb9   : > { %917 = vmatprep.subr.bf16.mxu0 %v1228_v0 }
  0xbc   : > { %918 = vmatpush3.bf16.msra.mxu0 %v1029_v23 }
  0xbd   : > { %919 = vmatprep.subr.bf16.mxu0 %v1228_v0 }
  0xc0   : > { %920 = vmatpush3.bf16.msra.mxu0 %v1030_v33 }
  0xc1   : > { %921 = vmatprep.subr.bf16.mxu0 %v1228_v0 }
  0xc4   : > { %922 = vmatpush3.bf16.msra.mxu0 %v1031_v34 }
 0x17a   : > { %v445_v25 = vpop.f32.mrb[0].mxu0 }
 0x17b   : > { %v446_v26 = vadd.f32 %v809_v24, %v445_v25  ;;  %v885_v27 = vpop.f32.mrb[1].mxu0 }
 0x17c   : > { %v448_v28 = vpop.f32.mrb[2].mxu0 }
 0x17d   : > { %vm451_vm1 = vcmp.ge.f32.partialorder %v446_v26, 0.0  ;;  %v452_v29 = vmul.f32 0.01, %v446_v26  ;;  %v886_v30 = vpop.f32.mrb[3].mxu0 }
 0x17f   : > { %v453_v31 = vsel %vm451_vm1, %v446_v26, %v452_v29 }
 0x180   : > { %v471_v32 = vpack.c.bf16 %v453_v31, %v453_v31 }
 0x182   : > { %904 = vmatmul.mubr.bf16.vlgmr.msra.gmra.mrb[0].mxu1 %v471_v32 }
 0x255   : > { %v560_v36 = vpop.f32.mrb[0].mxu1 }
 0x256   : > { %v561_v37 = vadd.f32 %v818_v35, %v560_v36  ;;  %v905_v38 = vpop.f32.mrb[1].mxu1 }
 0x257   : > { %v563_v39 = vpop.f32.mrb[2].mxu1 }
 0x258   : > { %vm566_vm2 = vcmp.ge.f32.partialorder %v561_v37, 0.0  ;;  %v567_v40 = vmul.f32 0.01, %v561_v37  ;;  %v906_v41 = vpop.f32.mrb[3].mxu1 }
 0x25a   : > { %v568_v42 = vsel %vm566_vm2, %v561_v37, %v567_v40 }
 0x25b   : > { %v586_v43 = vpack.c.bf16 %v568_v42, %v568_v42 }
 0x25d   : > { %924 = vmatmul.mubr.bf16.vlgmr.msra.gmra.mrb[4].mxu0 %v586_v43 }
 0x330   : > { %v675_v45 = vpop.f32.mrb[4].mxu0 }
 0x331   : > { %v676_v46 = vadd.f32 %v827_v44, %v675_v45  ;;  %v925_v47 = vpop.f32.mrb[5].mxu0 }
 0x332   : > { %v678_v48 = vpop.f32.mrb[6].mxu0 }
 0x333   : > { %681 = vst [vmem:[%s337_s15] sm:$0xff] %v676_v46  ;;  %v926_v49 = vpop.f32.mrb[7].mxu0 }
 0x334   : > { %1159 = shalt.err (!%p1156_p4)
}
 0x335   : > { %s1160_s8 = scalar_lea.hbm %s1533_s21, 128  ;;  %s1164_s14 = scalar_lea.hbm %s1584_s7, 256 }
 0x336   : > { %p1161_p0 = scmp.ne.s32.totalorder %s1533_s21, %s1160_s8  ;;  %p1165_p8 = scmp.lt.u32.totalorder %s1533_s21, %s1584_s7 }
 0x337   : > { %p1166_p13 = scmp.lt.u32.totalorder %s1164_s14, %s1160_s8  ;;  %p1168_p10 = scmp.lt.u32.totalorder %s1160_s8, %s1533_s21 }
 0x338   : > { %p1162_p9 = pnand %p1161_p0, %p1425_p5 }
 0x339   : > { %p1167_p6 = por %p1166_p13, %p1165_p8 }
 0x33a   : > { %p1163_p11 = pneg %p1162_p9 }
 0x33b   : > { %p1169_p3 = por %p1168_p10, %p1167_p6 }
 0x33d   : > { %p1170_p7 = pnand %p1169_p3, %p1163_p11 }
 0x33f   : > { %1173 = shalt.err (!%p1170_p7)
}
 0x340   : > { %941 = dma.vmem_to_hbm [thread:$0]  (%p1425_p5), %s1535_s29, 128, %s1533_s21, %s683_s16  }
 0x341 PF: > { %s1604_s15 = sld [smem:[#allocation15_spill]]  ;;  %s708_s12 = sand.u32 1, %s1208_s24  }
 0x342   : > { %p1606_p1 = scmp.ge.s32.totalorder %s1220_s27, 2  ;;  %s709_s17 = scalar_lea.sflag [#allocation4], %s708_s12 }
 0x347   : > { %p1605_p12 = scmp.ne.s32.totalorder %s1604_s15, 0 }
 0x349   : > { %p958_p2 = pnand %p1606_p1, %p1605_p12 }
 0x34b   : > { %1203 = dma.done.wait (!%p958_p2), %s709_s17, 128  }
 0x34c   : > { %1205 = vsyncadd (!%p958_p2), %s709_s17, 4294967168  ;;  %p22_p4 = scmp.ge.s32.totalorder %s1411_s22, 4   ;;  %s1607_s24 = smov %s1212_s25 }
 0x34d   : > { %s1608_s25 = smov %s1216_s26  ;;  %s1609_s26 = smov %s1421_s18 }
 0x34e   : > { %s1610_s27 = smov %s1411_s22  ;;  %24 = sbr.rel (!%p22_p4) target bundleno = 7 (0x7), region = 105 }
 0x355   :  { %714 = vsyncpa [#allocation3], 1 }
 0x356   :  { %716 = vsyncpa [#allocation3 + $0x1], 1 }
 0x357   :  { %717 = vsyncpa [#allocation6], 1 }
 0x358   :  { %718 = vsyncpa [#allocation9], 1 }
 0x359   :  { %719 = vsyncpa [#allocation4], 1 }
 0x35a   :  { %721 = vsyncpa [#allocation4 + $0x1], 1 }

// kernel: tpu_custom_call.1
= control target key start
LH: loop header
LB: loop body
LE: loop exit
PB: predicated region body
PF: predicated region fallthrough
CT: control target
= control target key end

     0   :  { %12 = vsyncpa [#allocation3], 0  ;;  %s1577_s0 = inlined_call_operand.hbm [shape: bf16[16,128], index: 0, kind: input, shape index: {}]   ;;  %s1578_s1 = inlined_call_operand.hbm [shape: bf16[128,128], index: 1, kind: input, shape index: {}]   ;;  %s1579_s2 = inlined_call_operand.vmem [shape: f32[1,128], index: 2, kind: input, shape index: {}]   ;;  %s1580_s3 = inlined_call_operand.hbm [shape: bf16[128,128], index: 3, kind: input, shape index: {}]   ;;  %s1581_s4 = inlined_call_operand.vmem [shape: f32[1,128], index: 4, kind: input, shape index: {}]   ;;  %s1582_s5 = inlined_call_operand.hbm [shape: bf16[128,128], index: 5, kind: input, shape index: {}]   ;;  %s1583_s6 = inlined_call_operand.vmem [shape: f32[1,128], index: 6, kind: input, shape index: {}]   ;;  %s1584_s7 = inlined_call_operand.hbm [shape: f32[16,128], index: 7, kind: output, shape index: {}]  }
   0x1   :  { %14 = vsyncpa [#allocation3 + $0x1], 0 }
   0x2   :  { %15 = vsyncpa [#allocation6], 0 }
   0x3   :  { %16 = vsyncpa [#allocation9], 0 }
   0x4   :  { %17 = vsyncpa [#allocation4], 0 }
   0x5   :  { %19 = vsyncpa [#allocation4 + $0x1], 0  ;;  %s1271_s24 = smov 0   ;;  %s1273_s25 = smov 0  }
   0x6   :  { %s1275_s26 = smov 0   ;;  %s1277_s27 = smov 0  }
   0x7 LB: > { %s1292_s28 = sadd.s32 4294967295, %s1220_s27   ;;  %s795_s29 = sadd.s32 4294967294, %s1220_s27   ;;  %s1220_s27 = sphi %s1277_s27, %s1610_s27   ;;  %s1216_s26 = sphi %s1275_s26, %s1609_s26   ;;  %s1212_s25 = sphi %s1273_s25, %s1608_s25   ;;  %s1208_s24 = sphi %s1271_s24, %s1607_s24  }
   0x8   : > { %p45_p0 = scmp.ne.s32.totalorder %s1212_s25, %s1208_s24  ;;  %p1585_p1 = scmp.eq.s32.totalorder %s1292_s28, 0 }
   0x9   : > { %p201_p3 = scmp.eq.s32.totalorder %s795_s29, 1  ;;  %p796_p5 = scmp.ge.s32.totalorder %s1220_s27, 1 }
   0xa   : > { %p1301_p4 = por %p1585_p1, %p45_p0  ;;  %p208_p7 = scmp.lt.s32.totalorder %s1220_s27, 3 }
   0xb   : > { %p1306_p6 = por %p201_p3, %p45_p0  ;;  %s1222_s10 = smov [#allocation5]  }
   0xc   : > { %s1589_s30 = scalar_select %p1301_p4, 1, 0 }
   0xd   : > { %s1590_s8 = scalar_select %p1306_p6, 1, 0 }
   0xe   : > { %p1311_p8 = pnand %p796_p5, %p208_p7  ;;  %s220_s11 = sshll.u32 %s1222_s10, 4  ;;  %s1315_s11 = int_to_ptr.vmem [resolvable:$true] %s220_s11 }
   0xf   : > { %1591 = sst [smem:[#allocation15_spill]] %s1590_s8  ;;  %s1223_s13 = smov [#allocation7]  }
  0x10   : > { %s1592_s9 = scalar_select %p1311_p8, 1, 0 }
  0x11   : > { %p943_p9 = pneg %p1311_p8  ;;  %s236_s14 = sshll.u32 %s1223_s13, 4  ;;  %s1326_s14 = int_to_ptr.vmem [resolvable:$true] %s236_s14 }
  0x12   : > { %s1224_s15 = smov [#allocation8]   ;;  %s1032_s19 = scalar_lea.hbm %s1578_s1, 1024 }
  0x13   : > { %p1322_p11 = pnand %p943_p9, %p1585_p1  ;;  %s1328_s16 = sshll.u32 %s1224_s15, 4  ;;  %s253_s16 = int_to_ptr.vmem [resolvable:$true] %s1328_s16 }
  0x14   : > { %p1033_p12 = scmp.ne.s32.totalorder %s1578_s1, %s1032_s19  ;;  %p1039_p5 = scmp.lt.u32.totalorder %s1032_s19, %s1578_s1 }
  0x15   : > { %p1338_p13 = pneg %p1322_p11 }
  0x17   : > { %p1035_p0 = pnand %p1338_p13, %p1033_p12 }
  0x19   : > { %p1036_p3 = pneg %p1035_p0 }
  0x1b   : > { %p1041_p7 = pnand %p1039_p5, %p1036_p3 }
  0x1d   : > { %1044 = shalt.err (!%p1041_p7)
}
  0x1e   : > { %s1045_s10 = scalar_lea.vmem %s1315_s11, 1024  ;;  %p1053_p2 = scmp.lt.s32.totalorder %s1315_s11, %s1315_s11 }
  0x1f   : > { %p1046_p9 = scmp.ne.s32.totalorder %s1315_s11, %s1045_s10  ;;  %p1054_p6 = scmp.lt.s32.totalorder %s1045_s10, %s1045_s10 }
  0x21   : > { %p1048_p10 = pnand %p1046_p9, %p1338_p13  ;;  %p1055_p12 = por %p1054_p6, %p1053_p2 }
  0x23   : > { %p1049_p1 = pneg %p1048_p10 }
  0x25   : > { %p1056_p0 = pnand %p1055_p12, %p1049_p1 }
  0x27   : > { %1059 = shalt.err (!%p1056_p0)
}
  0x28   : > { %s1225_s13 = smov 64   ;;  %s1226_s15 = smov 4  }
  0x29   : > { %946 = dma.hbm_to_vmem [thread:$0]  (!%p1322_p11), %s1578_s1, 1024, %s1315_s11, [#allocation6], %s1225_s13, %s1225_s13, %s1226_s15  }
  0x2a   : > { %s1060_s21 = scalar_lea.hbm %s1580_s3, 1024 }
  0x2b   : > { %p1061_p1 = scmp.ne.s32.totalorder %s1580_s3, %s1060_s21  ;;  %p1067_p10 = scmp.lt.u32.totalorder %s1060_s21, %s1580_s3 }
  0x2d   : > { %p1063_p2 = pnand %p1061_p1, %p1338_p13 }
  0x2f   : > { %p1064_p6 = pneg %p1063_p2 }
  0x31   : > { %p1069_p3 = pnand %p1067_p10, %p1064_p6 }
  0x33   : > { %1072 = shalt.err (!%p1069_p3)
}
  0x34   : > { %s1073_s11 = scalar_lea.vmem %s1326_s14, 1024  ;;  %p1081_p12 = scmp.lt.s32.totalorder %s1326_s14, %s1326_s14 }
  0x35   : > { %p1074_p5 = scmp.ne.s32.totalorder %s1326_s14, %s1073_s11  ;;  %p1082_p0 = scmp.lt.s32.totalorder %s1073_s11, %s1073_s11 }
  0x37   : > { %p1076_p7 = pnand %p1074_p5, %p1338_p13  ;;  %p1083_p1 = por %p1082_p0, %p1081_p12 }
  0x39   : > { %p1077_p9 = pneg %p1076_p7 }
  0x3b   : > { %p1084_p2 = pnand %p1083_p1, %p1077_p9 }
  0x3d   : > { %1087 = shalt.err (!%p1084_p2)
}
  0x3e   : > { %949 = dma.hbm_to_vmem [thread:$0]  (!%p1322_p11), %s1580_s3, 1024, %s1326_s14, [#allocation6], %s1225_s13, %s1225_s13, %s1226_s15  }
  0x3f   : > { %s1088_s20 = scalar_lea.hbm %s1582_s5, 1024 }
  0x40   : > { %p1089_p6 = scmp.ne.s32.totalorder %s1582_s5, %s1088_s20  ;;  %p1095_p5 = scmp.lt.u32.totalorder %s1088_s20, %s1582_s5 }
  0x42   : > { %p1091_p10 = pnand %p1089_p6, %p1338_p13 }
  0x44   : > { %p1092_p3 = pneg %p1091_p10 }
  0x46   : > { %p1097_p7 = pnand %p1095_p5, %p1092_p3 }
  0x48   : > { %1100 = shalt.err (!%p1097_p7)
}
  0x49   : > { %s1101_s11 = scalar_lea.vmem %s253_s16, 1024  ;;  %p1109_p1 = scmp.lt.s32.totalorder %s253_s16, %s253_s16 }
  0x4a   : > { %p1102_p9 = scmp.ne.s32.totalorder %s253_s16, %s1101_s11  ;;  %p1110_p2 = scmp.lt.s32.totalorder %s1101_s11, %s1101_s11 }
  0x4c   : > { %p1104_p12 = pnand %p1102_p9, %p1338_p13  ;;  %p1111_p4 = por %p1110_p2, %p1109_p1 }
  0x4e   : > { %p1105_p0 = pneg %p1104_p12 }
  0x50   : > { %p1112_p8 = pnand %p1111_p4, %p1105_p0 }
  0x52   : > { %1115 = shalt.err (!%p1112_p8)
}
  0x53   : > { %952 = dma.hbm_to_vmem [thread:$0]  (!%p1322_p11), %s1582_s5, 1024, %s253_s16, [#allocation9], %s1225_s13, %s1225_s13, %s1226_s15  }
  0x54   : > { %s1411_s22 = sadd.s32 1, %s1220_s27   ;;  %s32_s17 = sadd.s32 1, %s1216_s26 }
  0x55   : > { %s29_s12 = ssub.s32 %s1220_s27, %s1411_s22  ;;  %p39_p8 = scmp.ne.s32.totalorder %s1216_s26, %s1212_s25 }
  0x56   : > { %p30_p4 = scmp.eq.s32.totalorder %s29_s12, 0  ;;  %p40_p13 = scmp.eq.s32.totalorder %s1220_s27, 0 }
  0x57   : > { %p964_p6 = scmp.lt.s32.totalorder %s1220_s27, 2  ;;  %p1595_p3 = scmp.eq.s32.totalorder %s1292_s28, 1 }
  0x58   : > { %s1421_s18 = scalar_select %p30_p4, %s1216_s26, %s32_s17  }
  0x59   : > { %p41_p10 = por %p40_p13, %p39_p8  ;;  %p1425_p5 = por %p1595_p3, %p39_p8 }
  0x5a   : > { %s269_s20 = sand.u32 1, %s1216_s26   ;;  %s802_s21 = sshll.u32 %s1220_s27, 6 }
  0x5b   : > { %s801_s16 = sshll.u32 %s269_s20, 2  ;;  %s1434_s23 = scalar_lea.hbm %s1577_s0, %s802_s21 }
  0x5c   : > { %s273_s29 = scalar_lea.vmem [#allocation2], %s801_s16  ;;  %p1436_p11 = pnand %p964_p6, %p41_p10 }
  0x5d   : > { %s280_s10 = sshll.u32 %s273_s29, 4  ;;  %s270_s14 = scalar_lea.sflag [#allocation3], %s269_s20  ;;  %s1440_s10 = int_to_ptr.vmem [resolvable:$true] %s280_s10 }
  0x5e   : > { %s1116_s8 = scalar_lea.hbm %s1434_s23, 64  ;;  %p1118_p9 = pneg %p1436_p11 }
  0x5f   : > { %p1117_p7 = scmp.ne.s32.totalorder %s1434_s23, %s1116_s8  ;;  %s1121_s21 = scalar_lea.hbm %s1577_s0, 128 }
  0x60   : > { %p1122_p1 = scmp.lt.u32.totalorder %s1434_s23, %s1577_s0  ;;  %p1123_p2 = scmp.lt.u32.totalorder %s1121_s21, %s1116_s8 }
  0x61   : > { %p1119_p12 = pnand %p1118_p9, %p1117_p7  ;;  %p1125_p8 = scmp.lt.u32.totalorder %s1116_s8, %s1434_s23 }
  0x62   : > { %p1124_p4 = por %p1123_p2, %p1122_p1 }
  0x63   : > { %p1120_p0 = pneg %p1119_p12 }
  0x64   : > { %p1126_p13 = por %p1125_p8, %p1124_p4 }
  0x66   : > { %p1127_p6 = pnand %p1126_p13, %p1120_p0 }
  0x68   : > { %1130 = shalt.err (!%p1127_p6)
}
  0x69   : > { %s1131_s20 = scalar_lea.vmem %s1440_s10, 64  ;;  %s1227_s15 = smov [#allocation2]  }
  0x6a   : > { %p1132_p10 = scmp.ne.s32.totalorder %s1440_s10, %s1131_s20  ;;  %s1136_s29 = sshll.u32 %s1227_s15, 4  ;;  %s1137_s29 = int_to_ptr.vmem [resolvable:$false] %s1136_s29 }
  0x6b   : > { %s1138_s12 = scalar_lea.vmem %s1137_s29, 128  ;;  %p1139_p12 = scmp.lt.s32.totalorder %s1440_s10, %s1137_s29 }
  0x6c   : > { %p1134_p3 = pnand %p1132_p10, %p1118_p9  ;;  %p1140_p1 = scmp.lt.s32.totalorder %s1138_s12, %s1131_s20 }
  0x6e   : > { %p1135_p7 = pneg %p1134_p3  ;;  %p1141_p2 = por %p1140_p1, %p1139_p12 }
  0x70   : > { %p1142_p4 = pnand %p1141_p2, %p1135_p7 }
  0x72   : > { %1145 = shalt.err (!%p1142_p4)
}
  0x73   : > { %956 = dma.hbm_to_vmem [thread:$0]  (!%p1436_p11), %s1434_s23, 64, %s1440_s10, %s270_s14  }
  0x74   : > { %p1598_p0 = scmp.ne.s32.totalorder %s1592_s9, 0 }
  0x75   : > { %s1470_s8 = sand.u32 (!%p1598_p0), 1, %s1212_s25   ;;  %p1599_p9 = scmp.ne.s32.totalorder (!%p1598_p0), %s1589_s30, 0 }
  0x76   : > { %289 = sbr.rel (%p1598_p0) target bundleno = 833 (0x341), region = 48  ;;  %s804_s17 = sshll.u32 (!%p1598_p0), %s1470_s8, 2 }
  0x77   : > { %s292_s21 = scalar_lea.sflag (!%p1598_p0), [#allocation3], %s1470_s8  ;;  %s1474_s16 = scalar_lea.vmem (!%p1598_p0), [#allocation2], %s804_s17 }
  0x7d   : > { %1191 = dma.done.wait (%p1599_p9), %s292_s21, 64  }
  0x7e   : > { %1193 = vsyncadd (%p1599_p9), %s292_s21, 4294967232  ;;  %p1600_p11 = scmp.eq.s32.totalorder %s1292_s28, 0 }
  0x80   : > { %1195 = dma.done.wait (%p1600_p11), [#allocation6], 2048   ;;  %p1601_p8 = pmov %p1600_p11 }
  0x82   : > { %1197 = vsyncadd (%p1601_p8), [#allocation6], 4294965248  ;;  %p1602_p13 = pmov %p1601_p8 }
  0x83   : > { %p1603_p6 = pmov %p1601_p8 }
  0x84   : > { %1199 = dma.done.wait (%p1602_p13), [#allocation9], 1024  }
  0x85   : > { %1201 = vsyncadd (%p1603_p6), [#allocation9], 4294966272  ;;  %v1228_v0 = vmov 0.0   ;;  %vm1229_vm0 = vmmov 0   ;;  %v1008_v1 = vld [vmem:[#allocation5] sm:$0xff]   ;;  %v1009_v2 = vld [vmem:[#allocation5 + $0x8] sm:$0xff]  }
  0x86   : > { %867 = vmatprep.subr.bf16.mxu0 %v1228_v0  ;;  %883 = vmatprep.mubr.msk.bf16.mxu0 %vm1229_vm0, %v1228_v0  ;;  %v1010_v3 = vld [vmem:[#allocation5 + $0x10] sm:$0xff]   ;;  %v1016_v4 = vld [vmem:[#allocation7] sm:$0xff]   ;;  %v1011_v5 = vld [vmem:[#allocation5 + $0x18] sm:$0xff]   ;;  %s808_s11 = sshll.u32 %s1470_s8, 3  ;;  %s837_s20 = sshll.u32 %s1292_s28, 7 }
  0x87   : > { %887 = vmatprep.subr.bf16.mxu1 %v1228_v0  ;;  %903 = vmatprep.mubr.msk.bf16.mxu1 %vm1229_vm0, %v1228_v0  ;;  %v1017_v6 = vld [vmem:[#allocation7 + $0x8] sm:$0xff]   ;;  %v1012_v7 = vld [vmem:[#allocation5 + $0x20] sm:$0xff]   ;;  %v1018_v8 = vld [vmem:[#allocation7 + $0x10] sm:$0xff]   ;;  %s337_s15 = scalar_lea.vmem [#allocation10], %s808_s11  ;;  %s1533_s21 = scalar_lea.hbm %s1584_s7, %s837_s20 }
  0x88   : > { %868 = vmatpush3.bf16.msra.mxu0 %v1008_v1  ;;  %888 = vmatpush3.bf16.msra.mxu1 %v1016_v4  ;;  %v1013_v9 = vld [vmem:[#allocation5 + $0x28] sm:$0xff]   ;;  %v1019_v10 = vld [vmem:[#allocation7 + $0x18] sm:$0xff]   ;;  %v1014_v11 = vld [vmem:[#allocation5 + $0x30] sm:$0xff]   ;;  %s696_s29 = sshll.u32 %s337_s15, 4  ;;  %s1230_s30 = smov [#allocation10]   ;;  %s1535_s29 = int_to_ptr.vmem [resolvable:$true] %s696_s29 }
  0x89   : > { %869 = vmatprep.subr.bf16.mxu0 %v1228_v0  ;;  %889 = vmatprep.subr.bf16.mxu1 %v1228_v0  ;;  %v1020_v12 = vld [vmem:[#allocation7 + $0x20] sm:$0xff]   ;;  %v1015_v13 = vld [vmem:[#allocation5 + $0x38] sm:$0xff]   ;;  %v1021_v14 = vld [vmem:[#allocation7 + $0x28] sm:$0xff]   ;;  %s1146_s28 = scalar_lea.vmem %s1535_s29, 128  ;;  %s1150_s9 = sshll.u32 %s1230_s30, 4  ;;  %s1151_s9 = int_to_ptr.vmem [resolvable:$false] %s1150_s9 }
  0x8a   : > { %v339_v15 = vld [vmem:[%s1474_s16] sm:$0xf]  ;;  %v1022_v16 = vld [vmem:[#allocation7 + $0x30] sm:$0xff]   ;;  %v1024_v18 = vld [vmem:[#allocation8] sm:$0xff]   ;;  %s683_s16 = scalar_lea.sflag [#allocation4], %s1470_s8  ;;  %p1147_p10 = scmp.ne.s32.totalorder %s1535_s29, %s1146_s28 }
  0x8b   : > { %v1023_v17 = vld [vmem:[#allocation7 + $0x38] sm:$0xff]   ;;  %v1025_v19 = vld [vmem:[#allocation8 + $0x8] sm:$0xff]   ;;  %v1026_v20 = vld [vmem:[#allocation8 + $0x10] sm:$0xff]   ;;  %s1152_s23 = scalar_lea.vmem %s1151_s9, 256  ;;  %p1153_p12 = scmp.lt.s32.totalorder %s1535_s29, %s1151_s9 }
  0x8c   : > { %870 = vmatpush3.bf16.msra.mxu0 %v1009_v2  ;;  %890 = vmatpush3.bf16.msra.mxu1 %v1017_v6  ;;  %v1027_v21 = vld [vmem:[#allocation8 + $0x18] sm:$0xff]   ;;  %v1028_v22 = vld [vmem:[#allocation8 + $0x20] sm:$0xff]   ;;  %v1029_v23 = vld [vmem:[#allocation8 + $0x28] sm:$0xff]   ;;  %p1148_p3 = pnand %p1147_p10, %p1425_p5  ;;  %p1154_p1 = scmp.lt.s32.totalorder %s1152_s23, %s1146_s28 }
  0x8d   : > { %871 = vmatprep.subr.bf16.mxu0 %v1228_v0  ;;  %891 = vmatprep.subr.bf16.mxu1 %v1228_v0  ;;  %v809_v24 = vld [vmem:[%s1579_s2] ss:$0 sm:$0xff]  ;;  %v1030_v33 = vld [vmem:[#allocation8 + $0x30] sm:$0xff]  }
  0x8e   : > { %v1031_v34 = vld [vmem:[#allocation8 + $0x38] sm:$0xff]   ;;  %p1149_p7 = pneg %p1148_p3  ;;  %p1155_p2 = por %p1154_p1, %p1153_p12 }
  0x8f   : > { %v818_v35 = vld [vmem:[%s1581_s4] ss:$0 sm:$0xff] }
  0x90   : > { %872 = vmatpush3.bf16.msra.mxu0 %v1010_v3  ;;  %892 = vmatpush3.bf16.msra.mxu1 %v1018_v8  ;;  %v827_v44 = vld [vmem:[%s1583_s6] ss:$0 sm:$0xff]  ;;  %p1156_p4 = pnand %p1155_p2, %p1149_p7 }
  0x91   : > { %873 = vmatprep.subr.bf16.mxu0 %v1228_v0  ;;  %893 = vmatprep.subr.bf16.mxu1 %v1228_v0 }
  0x94   : > { %874 = vmatpush3.bf16.msra.mxu0 %v1011_v5  ;;  %894 = vmatpush3.bf16.msra.mxu1 %v1019_v10 }
  0x95   : > { %875 = vmatprep.subr.bf16.mxu0 %v1228_v0  ;;  %895 = vmatprep.subr.bf16.mxu1 %v1228_v0 }
  0x98   : > { %876 = vmatpush3.bf16.msra.mxu0 %v1012_v7  ;;  %896 = vmatpush3.bf16.msra.mxu1 %v1020_v12 }
  0x99   : > { %877 = vmatprep.subr.bf16.mxu0 %v1228_v0  ;;  %897 = vmatprep.subr.bf16.mxu1 %v1228_v0 }
  0x9c   : > { %878 = vmatpush3.bf16.msra.mxu0 %v1013_v9  ;;  %898 = vmatpush3.bf16.msra.mxu1 %v1021_v14 }
  0x9d   : > { %879 = vmatprep.subr.bf16.mxu0 %v1228_v0  ;;  %899 = vmatprep.subr.bf16.mxu1 %v1228_v0 }
  0xa0   : > { %880 = vmatpush3.bf16.msra.mxu0 %v1014_v11  ;;  %900 = vmatpush3.bf16.msra.mxu1 %v1022_v16 }
  0xa1   : > { %881 = vmatprep.subr.bf16.mxu0 %v1228_v0  ;;  %901 = vmatprep.subr.bf16.mxu1 %v1228_v0 }
  0xa4   : > { %882 = vmatpush3.bf16.msra.mxu0 %v1015_v13  ;;  %902 = vmatpush3.bf16.msra.mxu1 %v1023_v17 }
  0xa5   : > { %907 = vmatprep.subr.bf16.mxu0 %v1228_v0 }
  0xa7   : > { %884 = vmatmul.mubr.bf16.vlgmr.msra.gmra.mrb[0].mxu0 %v339_v15 }
  0xa8   : > { %923 = vmatprep.mubr.msk.bf16.mxu0 %vm1229_vm0, %v1228_v0  ;;  %908 = vmatpush3.bf16.msra.mxu0 %v1024_v18 }
  0xa9   : > { %909 = vmatprep.subr.bf16.mxu0 %v1228_v0 }
  0xac   : > { %910 = vmatpush3.bf16.msra.mxu0 %v1025_v19 }
  0xad   : > { %911 = vmatprep.subr.bf16.mxu0 %v1228_v0 }
  0xb0   : > { %912 = vmatpush3.bf16.msra.mxu0 %v1026_v20 }
  0xb1   : > { %913 = vmatprep.subr.bf16.mxu0 %v1228_v0 }
  0xb4   : > { %914 = vmatpush3.bf16.msra.mxu0 %v1027_v21 }
  0xb5   : > { %915 = vmatprep.subr.bf16.mxu0 %v1228_v0 }
  0xb8   : > { %916 = vmatpush3.bf16.msra.mxu0 %v1028_v22 }
  0xb9   : > { %917 = vmatprep.subr.bf16.mxu0 %v1228_v0 }
  0xbc   : > { %918 = vmatpush3.bf16.msra.mxu0 %v1029_v23 }
  0xbd   : > { %919 = vmatprep.subr.bf16.mxu0 %v1228_v0 }
  0xc0   : > { %920 = vmatpush3.bf16.msra.mxu0 %v1030_v33 }
  0xc1   : > { %921 = vmatprep.subr.bf16.mxu0 %v1228_v0 }
  0xc4   : > { %922 = vmatpush3.bf16.msra.mxu0 %v1031_v34 }
 0x17a   : > { %v445_v25 = vpop.f32.mrb[0].mxu0 }
 0x17b   : > { %v446_v26 = vadd.f32 %v809_v24, %v445_v25  ;;  %v885_v27 = vpop.f32.mrb[1].mxu0 }
 0x17c   : > { %v448_v28 = vpop.f32.mrb[2].mxu0 }
 0x17d   : > { %vm451_vm1 = vcmp.ge.f32.partialorder %v446_v26, 0.0  ;;  %v452_v29 = vmul.f32 0.01, %v446_v26  ;;  %v886_v30 = vpop.f32.mrb[3].mxu0 }
 0x17f   : > { %v453_v31 = vsel %vm451_vm1, %v446_v26, %v452_v29 }
 0x180   : > { %v471_v32 = vpack.c.bf16 %v453_v31, %v453_v31 }
 0x182   : > { %904 = vmatmul.mubr.bf16.vlgmr.msra.gmra.mrb[0].mxu1 %v471_v32 }
 0x255   : > { %v560_v36 = vpop.f32.mrb[0].mxu1 }
 0x256   : > { %v561_v37 = vadd.f32 %v818_v35, %v560_v36  ;;  %v905_v38 = vpop.f32.mrb[1].mxu1 }
 0x257   : > { %v563_v39 = vpop.f32.mrb[2].mxu1 }
 0x258   : > { %vm566_vm2 = vcmp.ge.f32.partialorder %v561_v37, 0.0  ;;  %v567_v40 = vmul.f32 0.01, %v561_v37  ;;  %v906_v41 = vpop.f32.mrb[3].mxu1 }
 0x25a   : > { %v568_v42 = vsel %vm566_vm2, %v561_v37, %v567_v40 }
 0x25b   : > { %v586_v43 = vpack.c.bf16 %v568_v42, %v568_v42 }
 0x25d   : > { %924 = vmatmul.mubr.bf16.vlgmr.msra.gmra.mrb[4].mxu0 %v586_v43 }
 0x330   : > { %v675_v45 = vpop.f32.mrb[4].mxu0 }
 0x331   : > { %v676_v46 = vadd.f32 %v827_v44, %v675_v45  ;;  %v925_v47 = vpop.f32.mrb[5].mxu0 }
 0x332   : > { %v678_v48 = vpop.f32.mrb[6].mxu0 }
 0x333   : > { %681 = vst [vmem:[%s337_s15] sm:$0xff] %v676_v46  ;;  %v926_v49 = vpop.f32.mrb[7].mxu0 }
 0x334   : > { %1159 = shalt.err (!%p1156_p4)
}
 0x335   : > { %s1160_s8 = scalar_lea.hbm %s1533_s21, 128  ;;  %s1164_s14 = scalar_lea.hbm %s1584_s7, 256 }
 0x336   : > { %p1161_p0 = scmp.ne.s32.totalorder %s1533_s21, %s1160_s8  ;;  %p1165_p8 = scmp.lt.u32.totalorder %s1533_s21, %s1584_s7 }
 0x337   : > { %p1166_p13 = scmp.lt.u32.totalorder %s1164_s14, %s1160_s8  ;;  %p1168_p10 = scmp.lt.u32.totalorder %s1160_s8, %s1533_s21 }
 0x338   : > { %p1162_p9 = pnand %p1161_p0, %p1425_p5 }
 0x339   : > { %p1167_p6 = por %p1166_p13, %p1165_p8 }
 0x33a   : > { %p1163_p11 = pneg %p1162_p9 }
 0x33b   : > { %p1169_p3 = por %p1168_p10, %p1167_p6 }
 0x33d   : > { %p1170_p7 = pnand %p1169_p3, %p1163_p11 }
 0x33f   : > { %1173 = shalt.err (!%p1170_p7)
}
 0x340   : > { %941 = dma.vmem_to_hbm [thread:$0]  (%p1425_p5), %s1535_s29, 128, %s1533_s21, %s683_s16  }
 0x341 PF: > { %s1604_s15 = sld [smem:[#allocation15_spill]]  ;;  %s708_s12 = sand.u32 1, %s1208_s24  }
 0x342   : > { %p1606_p1 = scmp.ge.s32.totalorder %s1220_s27, 2  ;;  %s709_s17 = scalar_lea.sflag [#allocation4], %s708_s12 }
 0x347   : > { %p1605_p12 = scmp.ne.s32.totalorder %s1604_s15, 0 }
 0x349   : > { %p958_p2 = pnand %p1606_p1, %p1605_p12 }
 0x34b   : > { %1203 = dma.done.wait (!%p958_p2), %s709_s17, 128  }
 0x34c   : > { %1205 = vsyncadd (!%p958_p2), %s709_s17, 4294967168  ;;  %p22_p4 = scmp.ge.s32.totalorder %s1411_s22, 4   ;;  %s1607_s24 = smov %s1212_s25 }
 0x34d   : > { %s1608_s25 = smov %s1216_s26  ;;  %s1609_s26 = smov %s1421_s18 }
 0x34e   : > { %s1610_s27 = smov %s1411_s22  ;;  %24 = sbr.rel (!%p22_p4) target bundleno = 7 (0x7), region = 105 }
 0x355   :  { %714 = vsyncpa [#allocation3], 1 }
 0x356   :  { %716 = vsyncpa [#allocation3 + $0x1], 1 }
 0x357   :  { %717 = vsyncpa [#allocation6], 1 }
 0x358   :  { %718 = vsyncpa [#allocation9], 1 }
 0x359   :  { %719 = vsyncpa [#allocation4], 1 }
 0x35a   :  { %721 = vsyncpa [#allocation4 + $0x1], 1 }

</bundles_post_ra>
